<compile_context>
chip_gen: v5e
topology: v5e:2x2
jax: 0.10.0
libtpu: 0.0.40
codegen_flags: <defaults>
</compile_context>

<pallas_src>
import numpy as np
import jax
import jax.numpy as jnp
from jax.experimental import pallas as pl
from jax.experimental.pallas import tpu as pltpu


# ----------------------------- configuration ------------------------------- #
CONV_CFG = [
    # (Cin, Cout, K, stride)
    (1, 2, 4, 2),
    (2, 3, 3, 2),
    (3, 5, 2, 2),
    (5, 10, 2, 1),
    (10, 10, 2, 1),
]
L_IN = 100
BN_EPS = 1e-5
F_PAD = 128          # lane-dense feature width for every layer
N_LAYERS = len(CONV_CFG) + 1   # 5 convs + 1 linear


# ----------------------------- Pallas kernel ------------------------------- #
def iegm_kernel(x_ref, a_ref, b_ref, o_ref):
    # x_ref : (TILE_B, 128)  activations (zero-padded lanes)
    # a_ref : (6, 128, 128)  folded conv/linear matrices (Toeplitz + BN folding)
    # b_ref : (6, 1, 128)    folded biases
    # o_ref : (TILE_B, 128)  logits live in lanes [0, 2); rest is zero
    h = x_ref[...]
    for i in range(N_LAYERS - 1):
        z = jnp.dot(h, a_ref[i], preferred_element_type=jnp.float32) + b_ref[i]
        h = jnp.maximum(z, 0.0)
    o_ref[...] = (
        jnp.dot(h, a_ref[N_LAYERS - 1], preferred_element_type=jnp.float32)
        + b_ref[N_LAYERS - 1]
    )


def _round_up(x, m):
    return (x + m - 1) // m * m


def iegm_forward(x_flat, A_stack, b_stack, tile_b=None):
    """x_flat: (B, 100) f32 -> (B, 2) f32 logits."""
    B, f_in = x_flat.shape
    if tile_b is None:
        # big lane/sublane-friendly tiles when batched, minimal padding otherwise
        tile_b = 256 if B >= 256 else _round_up(max(B, 8), 8)
    B_pad = _round_up(B, tile_b)

    x_pad = jnp.zeros((B_pad, F_PAD), jnp.float32).at[:B, :f_in].set(x_flat)

    out = pl.pallas_call(
        iegm_kernel,
        out_shape=jax.ShapeDtypeStruct((B_pad, F_PAD), jnp.float32),
        grid_spec=pltpu.PrefetchScalarGridSpec(
            num_scalar_prefetch=0,
            grid=(B_pad // tile_b,),
            in_specs=[
                pl.BlockSpec((tile_b, F_PAD), lambda i: (i, 0)),
                # weights/biases: same block every step -> stay resident in VMEM
                pl.BlockSpec((N_LAYERS, F_PAD, F_PAD), lambda i: (0, 0, 0)),
                pl.BlockSpec((N_LAYERS, 1, F_PAD), lambda i: (0, 0, 0)),
            ],
            out_specs=pl.BlockSpec((tile_b, F_PAD), lambda i: (i, 0)),
        ),
        compiler_params=pltpu.CompilerParams(
            dimension_semantics=("parallel",),
        ),
    )(x_pad, A_stack, b_stack)

    return out[:B, :2]


# --------------------------- Parameter building ---------------------------- #
def build_params(key):
    params = {"convs": [], "lin": None}
    for (cin, cout, k, _s) in CONV_CFG:
        key, kw, kb, kg, kbe, krm, krv = jax.random.split(key, 7)
        W = 0.3 * jax.random.normal(kw, (cout, cin, k), jnp.float32)
        b = 0.1 * jax.random.normal(kb, (cout,), jnp.float32)
        gamma = 1.0 + 0.1 * jax.random.normal(kg, (cout,), jnp.float32)
        beta = 0.1 * jax.random.normal(kbe, (cout,), jnp.float32)
        rm = 0.1 * jax.random.normal(krm, (cout,), jnp.float32)
        rv = 0.5 + jax.random.uniform(krv, (cout,), jnp.float32)
        params["convs"].append((W, b, gamma, beta, rm, rv))
    key, kw, kb = jax.random.split(key, 3)
    Wl = 0.1 * jax.random.normal(kw, (2, 100), jnp.float32)
    bl = 0.1 * jax.random.normal(kb, (2,), jnp.float32)
    params["lin"] = (Wl, bl)
    return params


def conv_as_matrix(W, bias, L_in, stride):
    """Dense Toeplitz matrix (right-multiply form) for a (K,1)/(s,1) Conv2d."""
    W = np.asarray(W)
    bias = np.asarray(bias)
    cout, cin, k = W.shape
    L_out = (L_in - k) // stride + 1
    A = np.zeros((cin * L_in, cout * L_out), dtype=np.float32)
    for co in range(cout):
        for t in range(L_out):
            for ci in range(cin):
                for kk in range(k):
                    A[ci * L_in + stride * t + kk, co * L_out + t] = W[co, ci, kk]
    bvec = np.repeat(bias, L_out).astype(np.float32)
    return A, bvec, L_out


def build_kernel_inputs(params):
    """Fold BN into the next layer's matrix/bias, pad to 128x128, stack."""
    mats, biases = [], []
    L = L_IN
    prev_scale = None  # flat per-feature BN scale of the previous layer
    prev_shift = None  # flat per-feature BN shift of the previous layer

    for (W, b, gamma, beta, rm, rv), (_cin, _cout, _k, stride) in zip(
        params["convs"], CONV_CFG
    ):
        A, bvec, L_out = conv_as_matrix(W, b, L, stride)  # (F_in, F_out), (F_out,)
        if prev_scale is not None:
            # h_prev = z_prev * s + t  =>  h_prev @ A + b = z_prev @ (diag(s)A) + (t@A + b)
            bvec = bvec + prev_shift @ A
            A = prev_scale[:, None] * A

        M = np.zeros((F_PAD, F_PAD), np.float32)
        M[: A.shape[0], : A.shape[1]] = A
        c = np.zeros((F_PAD,), np.float32)
        c[: bvec.shape[0]] = bvec
        mats.append(M)
        biases.append(c)

        inv = 1.0 / np.sqrt(np.asarray(rv) + BN_EPS)
        scale = np.asarray(gamma) * inv
        shift = np.asarray(beta) - np.asarray(rm) * scale
        prev_scale = np.repeat(scale, L_out).astype(np.float32)
        prev_shift = np.repeat(shift, L_out).astype(np.float32)
        L = L_out

    # Final Linear(100 -> 2), last BN folded in; padded to 128 output lanes.
    Wl, bl = params["lin"]
    Wt = np.asarray(Wl).T  # (100, 2)
    blv = np.asarray(bl) + prev_shift @ Wt
    Wt = prev_scale[:, None] * Wt
    M = np.zeros((F_PAD, F_PAD), np.float32)
    M[: Wt.shape[0], : Wt.shape[1]] = Wt
    c = np.zeros((F_PAD,), np.float32)
    c[: blv.shape[0]] = blv
    mats.append(M)
    biases.append(c)

    A_stack = jnp.asarray(np.stack(mats))                 # (6, 128, 128)
    b_stack = jnp.asarray(np.stack(biases))[:, None, :]   # (6, 1, 128)
    return A_stack, b_stack


# ------------------------- Pure-JAX reference (NCHW) ------------------------ #
def reference_forward(x_nchw, params):
    h = x_nchw
    for (W, b, gamma, beta, rm, rv), (_cin, _cout, _k, stride) in zip(
        params["convs"], CONV_CFG
    ):
        W4 = W[..., None]  # (O, I, K, 1)
        h = jax.lax.conv_general_dilated(
            h, W4, window_strides=(stride, 1), padding="VALID",
            dimension_numbers=("NCHW", "OIHW", "NCHW"),
        )
        h = h + b[None, :, None, None]
        h = jnp.maximum(h, 0.0)
        inv = 1.0 / jnp.sqrt(rv + BN_EPS)
        h = (h - rm[None, :, None, None]) * (gamma * inv)[None, :, None, None] \
            + beta[None, :, None, None]
    h = h.reshape(h.shape[0], -1)  # (B, 100) channel-major, same as torch .view
    Wl, bl = params["lin"]
    return h @ Wl.T + bl[None, :]


# ----------------------------------- main ----------------------------------- #
if __name__ == "__main__":
    key = jax.random.PRNGKey(0)
    kparams, kx = jax.random.split(key)

    params = build_params(kparams)
    A_stack, b_stack = build_kernel_inputs(params)

    B = 4
    x = jax.random.normal(kx, (B, 1, L_IN, 1), jnp.float32)  # NCHW like torch
    x_flat = x.reshape(B, L_IN)  # C=1, W=1 -> flat length-100 signal

    out = iegm_forward(x_flat, A_stack, b_stack)
    out = jax.block_until_ready(out)

    ref = reference_forward(x, params)
    np.testing.assert_allclose(np.asarray(out), np.asarray(ref), rtol=2e-3, atol=2e-3)

    print("KERNEL_OK")
</pallas_src>

<mosaic_0001>
module attributes {stable_mosaic.version = 11 : i64} {
  func.func @iegm_kernel(%arg0: i32, %arg1: memref<8x128xf32, #tpu.memory_space<vmem>>, %arg2: memref<6x128x128xf32, #tpu.memory_space<vmem>>, %arg3: memref<6x1x128xf32, #tpu.memory_space<vmem>>, %arg4: memref<8x128xf32, #tpu.memory_space<vmem>>) attributes {dimension_semantics = [#tpu.dimension_semantics<parallel>], iteration_bounds = array<i64: 1>, scalar_prefetch = 0 : i64, scratch_operands = 0 : i64, tpu.core_type = #tpu.core_type<tc>, window_params = [{transform_indices = @transform_0, window_bounds = array<i64: 8, 128>}, {pipeline_mode = #tpu.pipeline_mode<synchronous>, transform_indices = @transform_1, window_bounds = array<i64: 6, 128, 128>}, {pipeline_mode = #tpu.pipeline_mode<synchronous>, transform_indices = @transform_2, window_bounds = array<i64: 6, 1, 128>}, {transform_indices = @transform_3, window_bounds = array<i64: 8, 128>}]} {
    %c0 = arith.constant 0 : index
    %c0_0 = arith.constant 0 : index
    %0 = vector.load %arg1[%c0, %c0_0] : memref<8x128xf32, #tpu.memory_space<vmem>>, vector<8x128xf32>
    %c0_1 = arith.constant 0 : index
    %c0_2 = arith.constant 0 : index
    %c0_3 = arith.constant 0 : index
    %1 = vector.load %arg2[%c0_1, %c0_2, %c0_3] : memref<6x128x128xf32, #tpu.memory_space<vmem>>, vector<1x128x128xf32>
    %2 = vector.shape_cast %1 : vector<1x128x128xf32> to vector<128x128xf32>
    %cst = arith.constant dense<0.000000e+00> : vector<8x128xf32>
    %3 = tpu.matmul %0, %2, %cst {dimension_numbers = #tpu.dot_dimension_numbers<[1], [0], [0], [1], [0, 0, 1, 1], [], []>} : vector<8x128xf32>, vector<128x128xf32>, vector<8x128xf32> -> vector<8x128xf32>
    %c0_4 = arith.constant 0 : index
    %c0_5 = arith.constant 0 : index
    %c0_6 = arith.constant 0 : index
    %4 = vector.load %arg3[%c0_4, %c0_5, %c0_6] : memref<6x1x128xf32, #tpu.memory_space<vmem>>, vector<1x1x128xf32>
    %5 = vector.shape_cast %4 : vector<1x1x128xf32> to vector<1x128xf32>
    %6 = vector.broadcast %5 : vector<1x128xf32> to vector<8x128xf32>
    %7 = arith.addf %3, %6 : vector<8x128xf32>
    %cst_7 = arith.constant 0.000000e+00 : f32
    %8 = vector.broadcast %cst_7 : f32 to vector<8x128xf32>
    %9 = arith.maximumf %7, %8 : vector<8x128xf32>
    %c1 = arith.constant 1 : index
    %c0_8 = arith.constant 0 : index
    %c0_9 = arith.constant 0 : index
    %10 = vector.load %arg2[%c1, %c0_8, %c0_9] : memref<6x128x128xf32, #tpu.memory_space<vmem>>, vector<1x128x128xf32>
    %11 = vector.shape_cast %10 : vector<1x128x128xf32> to vector<128x128xf32>
    %cst_10 = arith.constant dense<0.000000e+00> : vector<8x128xf32>
    %12 = tpu.matmul %9, %11, %cst_10 {dimension_numbers = #tpu.dot_dimension_numbers<[1], [0], [0], [1], [0, 0, 1, 1], [], []>} : vector<8x128xf32>, vector<128x128xf32>, vector<8x128xf32> -> vector<8x128xf32>
    %c1_11 = arith.constant 1 : index
    %c0_12 = arith.constant 0 : index
    %c0_13 = arith.constant 0 : index
    %13 = vector.load %arg3[%c1_11, %c0_12, %c0_13] : memref<6x1x128xf32, #tpu.memory_space<vmem>>, vector<1x1x128xf32>
    %14 = vector.shape_cast %13 : vector<1x1x128xf32> to vector<1x128xf32>
    %15 = vector.broadcast %14 : vector<1x128xf32> to vector<8x128xf32>
    %16 = arith.addf %12, %15 : vector<8x128xf32>
    %cst_14 = arith.constant 0.000000e+00 : f32
    %17 = vector.broadcast %cst_14 : f32 to vector<8x128xf32>
    %18 = arith.maximumf %16, %17 : vector<8x128xf32>
    %c2 = arith.constant 2 : index
    %c0_15 = arith.constant 0 : index
    %c0_16 = arith.constant 0 : index
    %19 = vector.load %arg2[%c2, %c0_15, %c0_16] : memref<6x128x128xf32, #tpu.memory_space<vmem>>, vector<1x128x128xf32>
    %20 = vector.shape_cast %19 : vector<1x128x128xf32> to vector<128x128xf32>
    %cst_17 = arith.constant dense<0.000000e+00> : vector<8x128xf32>
    %21 = tpu.matmul %18, %20, %cst_17 {dimension_numbers = #tpu.dot_dimension_numbers<[1], [0], [0], [1], [0, 0, 1, 1], [], []>} : vector<8x128xf32>, vector<128x128xf32>, vector<8x128xf32> -> vector<8x128xf32>
    %c2_18 = arith.constant 2 : index
    %c0_19 = arith.constant 0 : index
    %c0_20 = arith.constant 0 : index
    %22 = vector.load %arg3[%c2_18, %c0_19, %c0_20] : memref<6x1x128xf32, #tpu.memory_space<vmem>>, vector<1x1x128xf32>
    %23 = vector.shape_cast %22 : vector<1x1x128xf32> to vector<1x128xf32>
    %24 = vector.broadcast %23 : vector<1x128xf32> to vector<8x128xf32>
    %25 = arith.addf %21, %24 : vector<8x128xf32>
    %cst_21 = arith.constant 0.000000e+00 : f32
    %26 = vector.broadcast %cst_21 : f32 to vector<8x128xf32>
    %27 = arith.maximumf %25, %26 : vector<8x128xf32>
    %c3 = arith.constant 3 : index
    %c0_22 = arith.constant 0 : index
    %c0_23 = arith.constant 0 : index
    %28 = vector.load %arg2[%c3, %c0_22, %c0_23] : memref<6x128x128xf32, #tpu.memory_space<vmem>>, vector<1x128x128xf32>
    %29 = vector.shape_cast %28 : vector<1x128x128xf32> to vector<128x128xf32>
    %cst_24 = arith.constant dense<0.000000e+00> : vector<8x128xf32>
    %30 = tpu.matmul %27, %29, %cst_24 {dimension_numbers = #tpu.dot_dimension_numbers<[1], [0], [0], [1], [0, 0, 1, 1], [], []>} : vector<8x128xf32>, vector<128x128xf32>, vector<8x128xf32> -> vector<8x128xf32>
    %c3_25 = arith.constant 3 : index
    %c0_26 = arith.constant 0 : index
    %c0_27 = arith.constant 0 : index
    %31 = vector.load %arg3[%c3_25, %c0_26, %c0_27] : memref<6x1x128xf32, #tpu.memory_space<vmem>>, vector<1x1x128xf32>
    %32 = vector.shape_cast %31 : vector<1x1x128xf32> to vector<1x128xf32>
    %33 = vector.broadcast %32 : vector<1x128xf32> to vector<8x128xf32>
    %34 = arith.addf %30, %33 : vector<8x128xf32>
    %cst_28 = arith.constant 0.000000e+00 : f32
    %35 = vector.broadcast %cst_28 : f32 to vector<8x128xf32>
    %36 = arith.maximumf %34, %35 : vector<8x128xf32>
    %c4 = arith.constant 4 : index
    %c0_29 = arith.constant 0 : index
    %c0_30 = arith.constant 0 : index
    %37 = vector.load %arg2[%c4, %c0_29, %c0_30] : memref<6x128x128xf32, #tpu.memory_space<vmem>>, vector<1x128x128xf32>
    %38 = vector.shape_cast %37 : vector<1x128x128xf32> to vector<128x128xf32>
    %cst_31 = arith.constant dense<0.000000e+00> : vector<8x128xf32>
    %39 = tpu.matmul %36, %38, %cst_31 {dimension_numbers = #tpu.dot_dimension_numbers<[1], [0], [0], [1], [0, 0, 1, 1], [], []>} : vector<8x128xf32>, vector<128x128xf32>, vector<8x128xf32> -> vector<8x128xf32>
    %c4_32 = arith.constant 4 : index
    %c0_33 = arith.constant 0 : index
    %c0_34 = arith.constant 0 : index
    %40 = vector.load %arg3[%c4_32, %c0_33, %c0_34] : memref<6x1x128xf32, #tpu.memory_space<vmem>>, vector<1x1x128xf32>
    %41 = vector.shape_cast %40 : vector<1x1x128xf32> to vector<1x128xf32>
    %42 = vector.broadcast %41 : vector<1x128xf32> to vector<8x128xf32>
    %43 = arith.addf %39, %42 : vector<8x128xf32>
    %cst_35 = arith.constant 0.000000e+00 : f32
    %44 = vector.broadcast %cst_35 : f32 to vector<8x128xf32>
    %45 = arith.maximumf %43, %44 : vector<8x128xf32>
    %c5 = arith.constant 5 : index
    %c0_36 = arith.constant 0 : index
    %c0_37 = arith.constant 0 : index
    %46 = vector.load %arg2[%c5, %c0_36, %c0_37] : memref<6x128x128xf32, #tpu.memory_space<vmem>>, vector<1x128x128xf32>
    %47 = vector.shape_cast %46 : vector<1x128x128xf32> to vector<128x128xf32>
    %cst_38 = arith.constant dense<0.000000e+00> : vector<8x128xf32>
    %48 = tpu.matmul %45, %47, %cst_38 {dimension_numbers = #tpu.dot_dimension_numbers<[1], [0], [0], [1], [0, 0, 1, 1], [], []>} : vector<8x128xf32>, vector<128x128xf32>, vector<8x128xf32> -> vector<8x128xf32>
    %c5_39 = arith.constant 5 : index
    %c0_40 = arith.constant 0 : index
    %c0_41 = arith.constant 0 : index
    %49 = vector.load %arg3[%c5_39, %c0_40, %c0_41] : memref<6x1x128xf32, #tpu.memory_space<vmem>>, vector<1x1x128xf32>
    %50 = vector.shape_cast %49 : vector<1x1x128xf32> to vector<1x128xf32>
    %51 = vector.broadcast %50 : vector<1x128xf32> to vector<8x128xf32>
    %52 = arith.addf %48, %51 : vector<8x128xf32>
    %c0_42 = arith.constant 0 : index
    %c0_43 = arith.constant 0 : index
    %53 = vector.load %arg4[%c0_42, %c0_43] : memref<8x128xf32, #tpu.memory_space<vmem>>, vector<8x128xf32>
    tpu.vector_store %arg4[%c0_42, %c0_43], %52 {strides = array<i32>} : memref<8x128xf32, #tpu.memory_space<vmem>>, vector<8x128xf32>,
    return
  }
  func.func @transform_0(%arg0: i32) -> (i32, i32) {
    %c0_i32 = arith.constant 0 : i32
    %c0_i32_0 = arith.constant 0 : i32
    return %arg0, %c0_i32 : i32, i32
  }
  func.func @transform_1(%arg0: i32) -> (i32, i32, i32) {
    %c0_i32 = arith.constant 0 : i32
    %c0_i32_0 = arith.constant 0 : i32
    %c0_i32_1 = arith.constant 0 : i32
    %c0_i32_2 = arith.constant 0 : i32
    return %c0_i32, %c0_i32_0, %c0_i32_1 : i32, i32, i32
  }
  func.func @transform_2(%arg0: i32) -> (i32, i32, i32) {
    %c0_i32 = arith.constant 0 : i32
    %c0_i32_0 = arith.constant 0 : i32
    %c0_i32_1 = arith.constant 0 : i32
    %c0_i32_2 = arith.constant 0 : i32
    return %c0_i32, %c0_i32_0, %c0_i32_1 : i32, i32, i32
  }
  func.func @transform_3(%arg0: i32) -> (i32, i32) {
    %c0_i32 = arith.constant 0 : i32
    %c0_i32_0 = arith.constant 0 : i32
    return %arg0, %c0_i32 : i32, i32
  }
}

</mosaic_0001>

<bundles_post_ra>
// kernel: tpu_custom_call.1
= control target key start
LH: loop header
LB: loop body
LE: loop exit
PB: predicated region body
PF: predicated region fallthrough
CT: control target
= control target key end

     0   :  { %8 = vsyncpa [#allocation3], 0  ;;  %s491_s0 = inlined_call_operand.hbm [shape: f32[8,128], index: 0, kind: input, shape index: {}]   ;;  %s492_s1 = inlined_call_operand.hbm [shape: f32[6,128,128], index: 1, kind: input, shape index: {}]   ;;  %s493_s2 = inlined_call_operand.hbm [shape: f32[6,1,128], index: 2, kind: input, shape index: {}]   ;;  %s494_s3 = inlined_call_operand.hbm [shape: f32[8,128], index: 3, kind: output, shape index: {}]  }
   0x1   :  { %9 = vsyncpa [#allocation6], 0  ;;  %s26_s14 = sshll.u32 %s492_s1, 4  ;;  %s27_s14 = int_to_ptr.hbm [resolvable:$true] %s26_s14 }
   0x2   :  { %10 = vsyncpa [#allocation4], 0  ;;  %s451_s15 = smov [#allocation5]   ;;  %s16_s19 = sshll.u32 %s491_s0, 4  ;;  %s17_s19 = int_to_ptr.hbm [resolvable:$true] %s16_s19 }
   0x3   :  { %s28_s16 = sshll.u32 %s451_s15, 4  ;;  %s452_s20 = smov 128   ;;  %s29_s16 = int_to_ptr.vmem [resolvable:$true] %s28_s16 }
   0x4   :  { %s453_s21 = smov 8   ;;  %s454_s22 = smov [#allocation2]  }
   0x5   :  { %34 = dma.hbm_to_vmem [thread:$0]  %s27_s14, 12288, %s29_s16, [#allocation6], %s452_s20, %s452_s20, %s453_s21  }
   0x6   :  { %s18_s23 = sshll.u32 %s454_s22, 4  ;;  %s39_s26 = sshll.u32 %s493_s2, 4  ;;  %s19_s23 = int_to_ptr.vmem [resolvable:$true] %s18_s23  ;;  %s40_s26 = int_to_ptr.hbm [resolvable:$true] %s39_s26 }
   0x7   :  { %21 = dma.hbm_to_vmem [thread:$0]  %s17_s19, 128, %s19_s23, [#allocation3]  }
   0x8   :  { %s455_s1 = smov [#allocation7]   ;;  %s456_s28 = smov 16  }
   0x9   :  { %s41_s27 = sshll.u32 %s455_s1, 4  ;;  %s457_s29 = smov 1   ;;  %s42_s27 = int_to_ptr.vmem [resolvable:$true] %s41_s27 }
   0xa   :  { %47 = dma.hbm_to_vmem [thread:$0]  %s40_s26, 96, %s42_s27, [#allocation6], %s456_s28, %s456_s28, %s457_s29  }
   0xb   :  { %445 = dma.done.wait [#allocation3], 128  }
   0xc   :  { %446 = vsyncadd [#allocation3], 4294967168 }
   0xd   :  { %447 = dma.done.wait [#allocation6], 12384  }
   0xe   :  { %448 = vsyncadd [#allocation6], 4294954912  ;;  %v76_v0 = vld [vmem:[#allocation5 + $0x78] sm:$0xff]  ;;  %v75_v1 = vld [vmem:[#allocation5 + $0x70] sm:$0xff]  ;;  %s458_s0 = smov [#allocation8]   ;;  %s324_s5 = sshll.u32 %s494_s3, 4  ;;  %s325_s5 = int_to_ptr.hbm [resolvable:$true] %s324_s5 }
   0xf   :  { %81 = vmatpush.msra.mxu0 %v76_v0  ;;  %v74_v2 = vld [vmem:[#allocation5 + $0x68] sm:$0xff]  ;;  %v73_v3 = vld [vmem:[#allocation5 + $0x60] sm:$0xff]  ;;  %v118_v4 = vld [vmem:[#allocation5 + $0xf8] sm:$0xff]  ;;  %s322_s2 = sshll.u32 %s458_s0, 4  ;;  %s323_s2 = int_to_ptr.vmem [resolvable:$true] %s322_s2 }
  0x10   :  { %v72_v5 = vld [vmem:[#allocation5 + $0x58] sm:$0xff]  ;;  %124 = vmatpush.msra.mxu1 %v118_v4  ;;  %v117_v6 = vld [vmem:[#allocation5 + $0xf0] sm:$0xff]  ;;  %v116_v7 = vld [vmem:[#allocation5 + $0xe8] sm:$0xff] }
  0x11   :  { %82 = vmatpush.msra.mxu0 %v75_v1  ;;  %v71_v8 = vld [vmem:[#allocation5 + $0x50] sm:$0xff]  ;;  %v70_v9 = vld [vmem:[#allocation5 + $0x48] sm:$0xff]  ;;  %v115_v10 = vld [vmem:[#allocation5 + $0xe0] sm:$0xff] }
  0x12   :  { %125 = vmatpush.msra.mxu1 %v117_v6  ;;  %v114_v11 = vld [vmem:[#allocation5 + $0xd8] sm:$0xff]  ;;  %v69_v12 = vld [vmem:[#allocation5 + $0x40] sm:$0xff]  ;;  %v113_v13 = vld [vmem:[#allocation5 + $0xd0] sm:$0xff] }
  0x13   :  { %83 = vmatpush.msra.mxu0 %v74_v2  ;;  %v68_v14 = vld [vmem:[#allocation5 + $0x38] sm:$0xff]  ;;  %v112_v15 = vld [vmem:[#allocation5 + $0xc8] sm:$0xff]  ;;  %v67_v16 = vld [vmem:[#allocation5 + $0x30] sm:$0xff] }
  0x14   :  { %126 = vmatpush.msra.mxu1 %v116_v7  ;;  %v111_v17 = vld [vmem:[#allocation5 + $0xc0] sm:$0xff]  ;;  %v66_v18 = vld [vmem:[#allocation5 + $0x28] sm:$0xff]  ;;  %v110_v19 = vld [vmem:[#allocation5 + $0xb8] sm:$0xff] }
  0x15   :  { %84 = vmatpush.msra.mxu0 %v73_v3  ;;  %v65_v20 = vld [vmem:[#allocation5 + $0x20] sm:$0xff]  ;;  %v109_v21 = vld [vmem:[#allocation5 + $0xb0] sm:$0xff]  ;;  %v64_v22 = vld [vmem:[#allocation5 + $0x18] sm:$0xff] }
  0x16   :  { %127 = vmatpush.msra.mxu1 %v115_v10  ;;  %v108_v23 = vld [vmem:[#allocation5 + $0xa8] sm:$0xff]  ;;  %v63_v24 = vld [vmem:[#allocation5 + $0x10] sm:$0xff]  ;;  %v107_v25 = vld [vmem:[#allocation5 + $0xa0] sm:$0xff] }
  0x17   :  { %85 = vmatpush.msra.mxu0 %v72_v5  ;;  %v62_v26 = vld [vmem:[#allocation5 + $0x8] sm:$0xff]  ;;  %v106_v27 = vld [vmem:[#allocation5 + $0x98] sm:$0xff]  ;;  %v61_v28 = vld [vmem:[#allocation5] sm:$0xff] }
  0x18   :  { %128 = vmatpush.msra.mxu1 %v114_v11  ;;  %v60_v29 = vld [vmem:[#allocation2] sm:$0xff]  ;;  %v105_v30 = vld [vmem:[#allocation5 + $0x90] sm:$0xff]  ;;  %v104_v31 = vld [vmem:[#allocation5 + $0x88] sm:$0xff] }
  0x19   :  { %86 = vmatpush.msra.mxu0 %v71_v8  ;;  %v103_v32 = vld [vmem:[#allocation5 + $0x80] sm:$0xff]  ;;  %v161_v33 = vld [vmem:[#allocation5 + $0x178] sm:$0xff]  ;;  %v160_v34 = vld [vmem:[#allocation5 + $0x170] sm:$0xff] }
  0x1a   :  { %129 = vmatpush.msra.mxu1 %v113_v13  ;;  %167 = vmatpush.msra.mxu2 %v161_v33  ;;  %v159_v35 = vld [vmem:[#allocation5 + $0x168] sm:$0xff]  ;;  %v158_v36 = vld [vmem:[#allocation5 + $0x160] sm:$0xff]  ;;  %v157_v37 = vld [vmem:[#allocation5 + $0x158] sm:$0xff] }
  0x1b   :  { %87 = vmatpush.msra.mxu0 %v70_v9  ;;  %v156_v38 = vld [vmem:[#allocation5 + $0x150] sm:$0xff]  ;;  %v155_v39 = vld [vmem:[#allocation5 + $0x148] sm:$0xff]  ;;  %v154_v40 = vld [vmem:[#allocation5 + $0x140] sm:$0xff] }
  0x1c   :  { %130 = vmatpush.msra.mxu1 %v112_v15  ;;  %168 = vmatpush.msra.mxu2 %v160_v34  ;;  %v153_v41 = vld [vmem:[#allocation5 + $0x138] sm:$0xff]  ;;  %v152_v42 = vld [vmem:[#allocation5 + $0x130] sm:$0xff]  ;;  %v151_v43 = vld [vmem:[#allocation5 + $0x128] sm:$0xff] }
  0x1d   :  { %88 = vmatpush.msra.mxu0 %v69_v12  ;;  %v150_v44 = vld [vmem:[#allocation5 + $0x120] sm:$0xff]  ;;  %v149_v45 = vld [vmem:[#allocation5 + $0x118] sm:$0xff]  ;;  %v148_v50 = vld [vmem:[#allocation5 + $0x110] sm:$0xff] }
  0x1e   :  { %131 = vmatpush.msra.mxu1 %v111_v17  ;;  %169 = vmatpush.msra.mxu2 %v159_v35  ;;  %v343_v46 = vld [vmem:[#allocation7] ss:$0 sm:$0xff]  ;;  %v147_v51 = vld [vmem:[#allocation5 + $0x108] sm:$0xff]  ;;  %v204_v53 = vld [vmem:[#allocation5 + $0x1f8] sm:$0xff] }
  0x1f   :  { %89 = vmatpush.msra.mxu0 %v68_v14  ;;  %v146_v52 = vld [vmem:[#allocation5 + $0x100] sm:$0xff]  ;;  %v203_v54 = vld [vmem:[#allocation5 + $0x1f0] sm:$0xff]  ;;  %210 = vmatpush.msra.mxu3 %v204_v53  ;;  %v202_v55 = vld [vmem:[#allocation5 + $0x1e8] sm:$0xff] }
  0x20   :  { %132 = vmatpush.msra.mxu1 %v110_v19  ;;  %170 = vmatpush.msra.mxu2 %v158_v36  ;;  %v201_v56 = vld [vmem:[#allocation5 + $0x1e0] sm:$0xff]  ;;  %v200_v57 = vld [vmem:[#allocation5 + $0x1d8] sm:$0xff]  ;;  %v199_v58 = vld [vmem:[#allocation5 + $0x1d0] sm:$0xff] }
  0x21   :  { %90 = vmatpush.msra.mxu0 %v67_v16  ;;  %211 = vmatpush.msra.mxu3 %v203_v54  ;;  %v198_v59 = vld [vmem:[#allocation5 + $0x1c8] sm:$0xff]  ;;  %v197_v60 = vld [vmem:[#allocation5 + $0x1c0] sm:$0xff]  ;;  %v196_v61 = vld [vmem:[#allocation5 + $0x1b8] sm:$0xff] }
  0x22   :  { %133 = vmatpush.msra.mxu1 %v109_v21  ;;  %171 = vmatpush.msra.mxu2 %v157_v37  ;;  %v195_v62 = vld [vmem:[#allocation5 + $0x1b0] sm:$0xff]  ;;  %v194_v63 = vld [vmem:[#allocation5 + $0x1a8] sm:$0xff]  ;;  %v193_v0 = vld [vmem:[#allocation5 + $0x1a0] sm:$0xff] }
  0x23   :  { %91 = vmatpush.msra.mxu0 %v66_v18  ;;  %212 = vmatpush.msra.mxu3 %v202_v55  ;;  %v192_v1 = vld [vmem:[#allocation5 + $0x198] sm:$0xff]  ;;  %v344_v2 = vld [vmem:[#allocation7 + $0x1] ss:$0 sm:$0xff]  ;;  %v191_v6 = vld [vmem:[#allocation5 + $0x190] sm:$0xff] }
  0x24   :  { %134 = vmatpush.msra.mxu1 %v108_v23  ;;  %172 = vmatpush.msra.mxu2 %v156_v38  ;;  %v190_v7 = vld [vmem:[#allocation5 + $0x188] sm:$0xff]  ;;  %v189_v8 = vld [vmem:[#allocation5 + $0x180] sm:$0xff]  ;;  %v247_v9 = vld [vmem:[#allocation5 + $0x278] sm:$0xff] }
  0x25   :  { %92 = vmatpush.msra.mxu0 %v65_v20  ;;  %213 = vmatpush.msra.mxu3 %v201_v56  ;;  %v246_v10 = vld [vmem:[#allocation5 + $0x270] sm:$0xff]  ;;  %v245_v11 = vld [vmem:[#allocation5 + $0x268] sm:$0xff]  ;;  %v244_v12 = vld [vmem:[#allocation5 + $0x260] sm:$0xff] }
  0x26   :  { %135 = vmatpush.msra.mxu1 %v107_v25  ;;  %173 = vmatpush.msra.mxu2 %v155_v39  ;;  %v243_v13 = vld [vmem:[#allocation5 + $0x258] sm:$0xff]  ;;  %v242_v14 = vld [vmem:[#allocation5 + $0x250] sm:$0xff]  ;;  %v241_v15 = vld [vmem:[#allocation5 + $0x248] sm:$0xff] }
  0x27   :  { %93 = vmatpush.msra.mxu0 %v64_v22  ;;  %214 = vmatpush.msra.mxu3 %v200_v57  ;;  %v240_v16 = vld [vmem:[#allocation5 + $0x240] sm:$0xff]  ;;  %v239_v17 = vld [vmem:[#allocation5 + $0x238] sm:$0xff]  ;;  %v238_v18 = vld [vmem:[#allocation5 + $0x230] sm:$0xff] }
  0x28   :  { %136 = vmatpush.msra.mxu1 %v106_v27  ;;  %174 = vmatpush.msra.mxu2 %v154_v40  ;;  %v237_v19 = vld [vmem:[#allocation5 + $0x228] sm:$0xff]  ;;  %v236_v20 = vld [vmem:[#allocation5 + $0x220] sm:$0xff]  ;;  %v235_v21 = vld [vmem:[#allocation5 + $0x218] sm:$0xff] }
  0x29   :  { %94 = vmatpush.msra.mxu0 %v63_v24  ;;  %215 = vmatpush.msra.mxu3 %v199_v58  ;;  %v345_v22 = vld [vmem:[#allocation7 + $0x2] ss:$0 sm:$0xff]  ;;  %v233_v27 = vld [vmem:[#allocation5 + $0x208] sm:$0xff]  ;;  %v286_v33 = vld [vmem:[#allocation5 + $0x2d8] sm:$0xff] }
  0x2a   :  { %137 = vmatpush.msra.mxu1 %v105_v30  ;;  %175 = vmatpush.msra.mxu2 %v153_v41  ;;  %v289_v30 = vld [vmem:[#allocation5 + $0x2f0] sm:$0xff]  ;;  %v284_v35 = vld [vmem:[#allocation5 + $0x2c8] sm:$0xff]  ;;  %v283_v36 = vld [vmem:[#allocation5 + $0x2c0] sm:$0xff] }
  0x2b   :  { %95 = vmatpush.msra.mxu0 %v62_v26  ;;  %216 = vmatpush.msra.mxu3 %v198_v59  ;;  %v234_v26 = vld [vmem:[#allocation5 + $0x210] sm:$0xff]  ;;  %v282_v37 = vld [vmem:[#allocation5 + $0x2b8] sm:$0xff]  ;;  %v280_v39 = vld [vmem:[#allocation5 + $0x2a8] sm:$0xff] }
  0x2c   :  { %138 = vmatpush.msra.mxu1 %v104_v31  ;;  %176 = vmatpush.msra.mxu2 %v152_v42  ;;  %v288_v31 = vld [vmem:[#allocation5 + $0x2e8] sm:$0xff]  ;;  %v285_v34 = vld [vmem:[#allocation5 + $0x2d0] sm:$0xff]  ;;  %v279_v40 = vld [vmem:[#allocation5 + $0x2a0] sm:$0xff] }
  0x2d   :  { %96 = vmatpush.msra.mxu0 %v61_v28  ;;  %217 = vmatpush.msra.mxu3 %v197_v60  ;;  %v232_v28 = vld [vmem:[#allocation5 + $0x200] sm:$0xff]  ;;  %v281_v38 = vld [vmem:[#allocation5 + $0x2b0] sm:$0xff]  ;;  %v278_v41 = vld [vmem:[#allocation5 + $0x298] sm:$0xff] }
  0x2e   :  { %97 = vmatmul.f32.vlgmr.msra.gmra.mxu0 %v60_v29  ;;  %139 = vmatpush.msra.mxu1 %v103_v32  ;;  %v290_v29 = vld [vmem:[#allocation5 + $0x2f8] sm:$0xff]  ;;  %v287_v32 = vld [vmem:[#allocation5 + $0x2e0] sm:$0xff] }
  0x2f   :  { %177 = vmatpush.msra.mxu2 %v151_v43  ;;  %218 = vmatpush.msra.mxu3 %v196_v61  ;;  %v346_v42 = vld [vmem:[#allocation7 + $0x3] ss:$0 sm:$0xff]  ;;  %v348_v53 = vld [vmem:[#allocation7 + $0x5] ss:$0 sm:$0xff] }
  0x30   :  { %253 = vmatpush.msrb.mxu0 %v247_v9  ;;  %296 = vmatpush.msrb.mxu1 %v290_v29 }
  0x31   :  { %178 = vmatpush.msra.mxu2 %v150_v44  ;;  %219 = vmatpush.msra.mxu3 %v195_v62 }
  0x32   :  { %254 = vmatpush.msrb.mxu0 %v246_v10  ;;  %297 = vmatpush.msrb.mxu1 %v289_v30 }
  0x33   :  { %179 = vmatpush.msra.mxu2 %v149_v45  ;;  %220 = vmatpush.msra.mxu3 %v194_v63 }
  0x34   :  { %255 = vmatpush.msrb.mxu0 %v245_v11  ;;  %298 = vmatpush.msrb.mxu1 %v288_v31 }
  0x35   :  { %180 = vmatpush.msra.mxu2 %v148_v50  ;;  %221 = vmatpush.msra.mxu3 %v193_v0 }
  0x36   :  { %256 = vmatpush.msrb.mxu0 %v244_v12  ;;  %299 = vmatpush.msrb.mxu1 %v287_v32 }
  0x37   :  { %181 = vmatpush.msra.mxu2 %v147_v51  ;;  %222 = vmatpush.msra.mxu3 %v192_v1 }
  0x38   :  { %257 = vmatpush.msrb.mxu0 %v243_v13  ;;  %300 = vmatpush.msrb.mxu1 %v286_v33 }
  0x39   :  { %182 = vmatpush.msra.mxu2 %v146_v52  ;;  %223 = vmatpush.msra.mxu3 %v191_v6 }
  0x3a   :  { %258 = vmatpush.msrb.mxu0 %v242_v14  ;;  %301 = vmatpush.msrb.mxu1 %v285_v34 }
  0x3b   :  { %224 = vmatpush.msra.mxu3 %v190_v7 }
  0x3c   :  { %259 = vmatpush.msrb.mxu0 %v241_v15  ;;  %302 = vmatpush.msrb.mxu1 %v284_v35 }
  0x3d   :  { %225 = vmatpush.msra.mxu3 %v189_v8 }
  0x3e   :  { %260 = vmatpush.msrb.mxu0 %v240_v16  ;;  %303 = vmatpush.msrb.mxu1 %v283_v36 }
  0x40   :  { %261 = vmatpush.msrb.mxu0 %v239_v17  ;;  %304 = vmatpush.msrb.mxu1 %v282_v37 }
  0x42   :  { %262 = vmatpush.msrb.mxu0 %v238_v18  ;;  %305 = vmatpush.msrb.mxu1 %v281_v38 }
  0x44   :  { %263 = vmatpush.msrb.mxu0 %v237_v19  ;;  %306 = vmatpush.msrb.mxu1 %v280_v39 }
  0x46   :  { %264 = vmatpush.msrb.mxu0 %v236_v20  ;;  %307 = vmatpush.msrb.mxu1 %v279_v40 }
  0x48   :  { %265 = vmatpush.msrb.mxu0 %v235_v21  ;;  %308 = vmatpush.msrb.mxu1 %v278_v41 }
  0x4a   :  { %266 = vmatpush.msrb.mxu0 %v234_v26 }
  0x4c   :  { %267 = vmatpush.msrb.mxu0 %v233_v27 }
  0x4e   :  { %268 = vmatpush.msrb.mxu0 %v232_v28 }
  0xab   :  { %v98_v47 = vpop.f32.mrf.mxu0 }
  0xac   :  { %v99_v48 = vadd.f32 %v343_v46, %v98_v47  ;;  %v277_v46 = vld [vmem:[#allocation5 + $0x290] sm:$0xff]  ;;  %v276_v47 = vld [vmem:[#allocation5 + $0x288] sm:$0xff] }
  0xad   :  { %309 = vmatpush.msrb.mxu1 %v277_v46 }
  0xae   :  { %v101_v49 = vmax.f32 %v99_v48, 0.0  ;;  %v275_v48 = vld [vmem:[#allocation5 + $0x280] sm:$0xff] }
  0xaf   :  { %310 = vmatpush.msrb.mxu1 %v276_v47 }
  0xb0   :  { %140 = vmatmul.f32.vlgmr.msra.gmra.mxu1 %v101_v49  ;;  %v347_v49 = vld [vmem:[#allocation7 + $0x4] ss:$0 sm:$0xff] }
  0xb1   :  { %311 = vmatpush.msrb.mxu1 %v275_v48 }
 0x12d   :  { %v141_v3 = vpop.f32.mrf.mxu1 }
 0x12e   :  { %v142_v4 = vadd.f32 %v344_v2, %v141_v3 }
 0x130   :  { %v144_v5 = vmax.f32 %v142_v4, 0.0 }
 0x132   :  { %183 = vmatmul.f32.vlgmr.msra.gmra.mxu2 %v144_v5 }
 0x1b5   :  { %v184_v23 = vpop.f32.mrf.mxu2 }
 0x1b6   :  { %v185_v24 = vadd.f32 %v345_v22, %v184_v23 }
 0x1b8   :  { %v187_v25 = vmax.f32 %v185_v24, 0.0 }
 0x1ba   :  { %226 = vmatmul.f32.vlgmr.msra.gmra.mxu3 %v187_v25 }
 0x23d   :  { %v227_v43 = vpop.f32.mrf.mxu3 }
 0x23e   :  { %v228_v44 = vadd.f32 %v346_v42, %v227_v43 }
 0x240   :  { %v230_v45 = vmax.f32 %v228_v44, 0.0 }
 0x242   :  { %269 = vmatmul.f32.vlgmr.msrb.gmra.mxu0 %v230_v45 }
 0x2bf   :  { %v270_v50 = vpop.f32.mrf.mxu0 }
 0x2c0   :  { %v271_v51 = vadd.f32 %v347_v49, %v270_v50 }
 0x2c2   :  { %v273_v52 = vmax.f32 %v271_v51, 0.0 }
 0x2c4   :  { %312 = vmatmul.f32.vlgmr.msrb.gmra.mxu1 %v273_v52 }
 0x341   :  { %v313_v54 = vpop.f32.mrf.mxu1 }
 0x342   :  { %v314_v55 = vadd.f32 %v348_v53, %v313_v54 }
 0x344   :  { %316 = vst [vmem:[#allocation8] sm:$0xff] %v314_v55 }
 0x345   :  { %327 = dma.vmem_to_hbm [thread:$0]  %s323_s2, 128, %s325_s5, [#allocation4]  }
 0x346   :  { %449 = dma.done.wait [#allocation4], 128  }
 0x347   :  { %450 = vsyncadd [#allocation4], 4294967168 }
 0x348   :  { %332 = vsyncpa [#allocation3], 1 }
 0x349   :  { %333 = vsyncpa [#allocation6], 1 }
 0x34a   :  { %334 = vsyncpa [#allocation4], 1 }

</bundles_post_ra>
